<compile_context>
chip_gen: v7x
topology: tpu7x:2x2x1
jax: 0.10.0
libtpu: 0.0.40
codegen_flags: <defaults>
</compile_context>

<pallas_src>
import math
import functools

import jax
import jax.numpy as jnp
from jax.experimental import pallas as pl
from jax.experimental.pallas import tpu as pltpu


def _round_up(a: int, b: int) -> int:
    return ((a + b - 1) // b) * b


def _build_fixed_table(c_in: int, d_model: int) -> jnp.ndarray:
    """Deterministic sinusoidal table, identical to the PyTorch __init__."""
    assert d_model % 2 == 0, "d_model must be even (same constraint as the torch code)"
    position = jnp.arange(c_in, dtype=jnp.float32)[:, None]                      # (c_in, 1)
    div_term = jnp.exp(
        jnp.arange(0, d_model, 2, dtype=jnp.float32) * -(math.log(10000.0) / d_model)
    )                                                                            # (d_model//2,)
    w = jnp.zeros((c_in, d_model), dtype=jnp.float32)
    w = w.at[:, 0::2].set(jnp.sin(position * div_term))
    w = w.at[:, 1::2].set(jnp.cos(position * div_term))
    return w


def _make_wide_table(w: jnp.ndarray, g: int) -> jnp.ndarray:
    """Block-diagonal replication so G consecutive tokens share one 128-lane row."""
    c_in, d_model = w.shape
    if g == 1:
        return w
    wb = jnp.zeros((g * c_in, g * d_model), w.dtype)
    for k in range(g):  # host-side build, tiny (g*c_in x 128)
        wb = wb.at[k * c_in:(k + 1) * c_in, k * d_model:(k + 1) * d_model].set(w)
    return wb


def _embed_kernel(idx_ref, w_ref, out_ref, *, c_in: int, g: int):
    # idx_ref: (R, G) int32 — G consecutive token indices per output row
    # w_ref:   (G*c_in, G*d_model) f32 block-diagonal table (grid-invariant, VMEM
    #          resident; only ~48 KB here — if c_in*d_model were large, give this
    #          BlockSpec pipeline_mode=pl.Buffered(1) to skip double-buffering)
    # out_ref: (R, G*d_model) f32 — lane-dense (G*d_model == 128 when d_model | 128)
    ids = idx_ref[...]                                                           # (R, G)
    rows = ids.shape[0]
    k_dim = g * c_in
    col = jax.lax.broadcasted_iota(jnp.int32, (rows, k_dim), 1)                  # (R, G*c_in)
    # Static tiny loop (g = 128 // d_model, e.g. 4): boolean OR accumulation,
    # one f32 convert at the end (keeps VALU work minimal; it hides under the
    # HBM output stores anyway).
    hit = col == ids[:, 0:1]
    for k in range(1, g):
        hit = jnp.logical_or(hit, col == (ids[:, k:k + 1] + k * c_in))
    onehot = hit.astype(jnp.float32)
    # Exact f32 row-select via one-hot @ block-diagonal table on the MXU.
    out_ref[...] = jnp.dot(onehot, w_ref[...], preferred_element_type=jnp.float32)


def fixed_embedding(x: jnp.ndarray, w: jnp.ndarray, *,
                    tile: int = 1024,
                    vmem_limit_bytes: int = 32 * 1024 * 1024) -> jnp.ndarray:
    """Pallas equivalent of FixedEmbedding.forward(x).

    `tile` is in tokens; sweep {256, 512, 1024, 2048} per chip (v6e tolerates
    the largest; keep >= 2 grid steps on real inputs so v7x uses both TCs).
    """
    c_in, d_model = w.shape
    orig_shape = x.shape
    idx = x.reshape(-1).astype(jnp.int32)                                        # (N,)
    n = idx.shape[0]

    # Lane grouping: pack G tokens per 128-lane output row when d_model | 128.
    g = (128 // d_model) if (d_model <= 128 and 128 % d_model == 0) else 1
    quantum = 8 * g                       # guarantees >= 8 full sublanes per out block
    tile = _round_up(max(tile, quantum), quantum)
    tile = min(tile, _round_up(n, quantum))                                      # clamp for tiny inputs
    n_pad = _round_up(n, tile)
    if n_pad != n:
        idx = jnp.pad(idx, (0, n_pad - n))                                       # pad with index 0 (valid row)
    idx2d = idx.reshape(n_pad // g, g)                                           # (M, G) int32, G ids per row

    w_big = _make_wide_table(w, g)                                               # (G*c_in, G*d_model)
    rows = tile // g                                                             # output rows per grid step

    out_flat = pl.pallas_call(
        functools.partial(_embed_kernel, c_in=c_in, g=g),
        out_shape=jax.ShapeDtypeStruct((n_pad // g, g * d_model), jnp.float32),
        grid_spec=pltpu.PrefetchScalarGridSpec(
            num_scalar_prefetch=0,
            grid=(n_pad // tile,),
            in_specs=[
                pl.BlockSpec((rows, g), lambda i: (i, 0)),                       # packed indices
                pl.BlockSpec((g * c_in, g * d_model), lambda i: (0, 0)),         # full wide table (grid-invariant)
            ],
            out_specs=pl.BlockSpec((rows, g * d_model), lambda i: (i, 0)),       # lane-dense output
        ),
        compiler_params=pltpu.CompilerParams(
            dimension_semantics=("parallel",),      # v7x: shards grid steps across 2 TCs
            vmem_limit_bytes=vmem_limit_bytes,      # explicit budget (safe on v5e/v6e/v7x)
        ),
    )(idx2d, w_big)

    out = out_flat.reshape(n_pad, d_model)          # row-major contiguous un-grouping (free)
    if n_pad != n:
        out = out[:n]                               # only taken when B*L isn't tile-aligned
    return out.reshape(*orig_shape, d_model)


if __name__ == "__main__":
    c_in, d_model = 24, 32
    B, L = 2, 8

    w = _build_fixed_table(c_in, d_model)
    key = jax.random.PRNGKey(0)

    # --- test 1: module-sized input (single grid step, tile-clamped path) ---
    x = jax.random.randint(key, (B, L), minval=0, maxval=c_in, dtype=jnp.int32)
    fe = jax.jit(fixed_embedding)
    y = jax.block_until_ready(fe(x, w))
    ref = jnp.take(w, x, axis=0)
    assert y.shape == (B, L, d_model)
    assert y.dtype == jnp.float32
    assert jnp.allclose(y, ref, atol=1e-6), "mismatch vs reference embedding lookup (test 1)"

    # --- test 2: non-aligned token count + small tile -> multi-step grid + padding path ---
    key2 = jax.random.PRNGKey(1)
    x2 = jax.random.randint(key2, (3, 50), minval=0, maxval=c_in, dtype=jnp.int32)
    fe_small = jax.jit(functools.partial(fixed_embedding, tile=64))
    y2 = jax.block_until_ready(fe_small(x2, w))
    ref2 = jnp.take(w, x2, axis=0)
    assert y2.shape == (3, 50, d_model)
    assert jnp.allclose(y2, ref2, atol=1e-6), "mismatch vs reference embedding lookup (test 2)"

    print("KERNEL_OK")
</pallas_src>

<mosaic_0001>
module attributes {stable_mosaic.version = 11 : i64} {
  func.func @_embed_kernel(%arg0: i32, %arg1: memref<8x4xi32, #tpu.memory_space<vmem>>, %arg2: memref<96x128xf32, #tpu.memory_space<vmem>>, %arg3: memref<8x128xf32, #tpu.memory_space<vmem>>) attributes {dimension_semantics = [#tpu.dimension_semantics<parallel>], iteration_bounds = array<i64: 1>, scalar_prefetch = 0 : i64, scratch_operands = 0 : i64, tpu.core_type = #tpu.core_type<tc>, window_params = [{transform_indices = @transform_0, window_bounds = array<i64: 8, 4>}, {pipeline_mode = #tpu.pipeline_mode<synchronous>, transform_indices = @transform_1, window_bounds = array<i64: 96, 128>}, {transform_indices = @transform_2, window_bounds = array<i64: 8, 128>}]} {
    %c0 = arith.constant 0 : index
    %c0_0 = arith.constant 0 : index
    %0 = vector.load %arg1[%c0, %c0_0] : memref<8x4xi32, #tpu.memory_space<vmem>>, vector<8x4xi32>
    %1 = tpu.iota {dimensions = array<i32: 1>} : vector<8x96xi32>
    %2 = vector.extract_strided_slice %0 {offsets = [0, 0], sizes = [8, 1], strides = [1, 1]} : vector<8x4xi32> to vector<8x1xi32>
    %3 = vector.broadcast %2 : vector<8x1xi32> to vector<8x96xi32>
    %4 = arith.cmpi eq, %1, %3 : vector<8x96xi32>
    %5 = vector.extract_strided_slice %0 {offsets = [0, 1], sizes = [8, 1], strides = [1, 1]} : vector<8x4xi32> to vector<8x1xi32>
    %c24_i32 = arith.constant 24 : i32
    %6 = vector.broadcast %c24_i32 : i32 to vector<8x1xi32>
    %7 = arith.addi %5, %6 : vector<8x1xi32>
    %8 = vector.broadcast %7 : vector<8x1xi32> to vector<8x96xi32>
    %9 = arith.cmpi eq, %1, %8 : vector<8x96xi32>
    %10 = arith.ori %4, %9 : vector<8x96xi1>
    %11 = vector.extract_strided_slice %0 {offsets = [0, 2], sizes = [8, 1], strides = [1, 1]} : vector<8x4xi32> to vector<8x1xi32>
    %c48_i32 = arith.constant 48 : i32
    %12 = vector.broadcast %c48_i32 : i32 to vector<8x1xi32>
    %13 = arith.addi %11, %12 : vector<8x1xi32>
    %14 = vector.broadcast %13 : vector<8x1xi32> to vector<8x96xi32>
    %15 = arith.cmpi eq, %1, %14 : vector<8x96xi32>
    %16 = arith.ori %10, %15 : vector<8x96xi1>
    %17 = vector.extract_strided_slice %0 {offsets = [0, 3], sizes = [8, 1], strides = [1, 1]} : vector<8x4xi32> to vector<8x1xi32>
    %c72_i32 = arith.constant 72 : i32
    %18 = vector.broadcast %c72_i32 : i32 to vector<8x1xi32>
    %19 = arith.addi %17, %18 : vector<8x1xi32>
    %20 = vector.broadcast %19 : vector<8x1xi32> to vector<8x96xi32>
    %21 = arith.cmpi eq, %1, %20 : vector<8x96xi32>
    %22 = arith.ori %16, %21 : vector<8x96xi1>
    %23 = arith.extui %22 : vector<8x96xi1> to vector<8x96xi32>
    %24 = arith.sitofp %23 : vector<8x96xi32> to vector<8x96xf32>
    %c0_1 = arith.constant 0 : index
    %c0_2 = arith.constant 0 : index
    %25 = vector.load %arg2[%c0_1, %c0_2] : memref<96x128xf32, #tpu.memory_space<vmem>>, vector<96x128xf32>
    %cst = arith.constant dense<0.000000e+00> : vector<8x128xf32>
    %26 = tpu.matmul %24, %25, %cst {dimension_numbers = #tpu.dot_dimension_numbers<[1], [0], [0], [1], [0, 0, 1, 1], [], []>} : vector<8x96xf32>, vector<96x128xf32>, vector<8x128xf32> -> vector<8x128xf32>
    %c0_3 = arith.constant 0 : index
    %c0_4 = arith.constant 0 : index
    %27 = vector.load %arg3[%c0_3, %c0_4] : memref<8x128xf32, #tpu.memory_space<vmem>>, vector<8x128xf32>
    tpu.vector_store %arg3[%c0_3, %c0_4], %26 {strides = array<i32>} : memref<8x128xf32, #tpu.memory_space<vmem>>, vector<8x128xf32>,
    return
  }
  func.func @transform_0(%arg0: i32) -> (i32, i32) {
    %c0_i32 = arith.constant 0 : i32
    %c0_i32_0 = arith.constant 0 : i32
    return %arg0, %c0_i32 : i32, i32
  }
  func.func @transform_1(%arg0: i32) -> (i32, i32) {
    %c0_i32 = arith.constant 0 : i32
    %c0_i32_0 = arith.constant 0 : i32
    %c0_i32_1 = arith.constant 0 : i32
    return %c0_i32, %c0_i32_0 : i32, i32
  }
  func.func @transform_2(%arg0: i32) -> (i32, i32) {
    %c0_i32 = arith.constant 0 : i32
    %c0_i32_0 = arith.constant 0 : i32
    return %arg0, %c0_i32 : i32, i32
  }
}

</mosaic_0001>

<bundles_post_ra>
// kernel: fixed_embedding.1
= control target key start
LH: loop header
LB: loop body
LE: loop exit
PB: predicated region body
PF: predicated region fallthrough
CT: control target
= control target key end

     0   :  { %v201_v0 = vmov 0   ;;  %v202_v2 = vmov 2   ;;  %v203_v6 = vmov 0.0|0.0   ;;  %v204_v15 = vmov 1   ;;  %s265_s0 = inlined_call_operand.vmem [shape: s32[8,4], index: 0, kind: input, shape index: {}]   ;;  %s266_s1 = inlined_call_operand.vmem [shape: f32[96,128], index: 1, kind: input, shape index: {}]   ;;  %s267_s2 = inlined_call_operand.vmem [shape: f32[8,128], index: 2, kind: output, shape index: {}]  }
   0x1   :  { %196 = vset.pattern.permute.xlu0 %v201_v0  ;;  %v11_v1 = vld [vmem:[%s265_s0] sm:$0xff]  ;;  %198 = vset.pattern.permute.xlu1 %v202_v2  ;;  %v39_v4 = vld [vmem:[%s266_s1 + $0x8] sm:$0xff]  ;;  %v40_v8 = vld [vmem:[%s266_s1 + $0x10] sm:$0xff]  ;;  %v205_v16 = vmov 3   ;;  %vm206_vm0 = vmmov 0   ;;  %v207_v20 = vmov 0.0   ;;  %v12_v28 = vlaneseq }
   0x2   :  { %v38_v3 = vld [vmem:[%s266_s1] sm:$0xff]  ;;  %15 = vperm.xlu0 %196, %v11_v1   ;;  %v24_v5 = vadd.s32 48, %v11_v1  ;;  %171 = vmatprep.subr.bf16.mxu0 %v203_v6  ;;  %v41_v9 = vld [vmem:[%s266_s1 + $0x18] sm:$0xff]  ;;  %v18_v10 = vadd.s32 24, %v11_v1  ;;  %v30_v12 = vadd.s32 72, %v11_v1  ;;  %v43_v14 = vld [vmem:[%s266_s1 + $0x28] sm:$0xff] }
   0x3   :  { %v172_v7 = vpack.c.bf16 %v39_v4, %v38_v3  ;;  %v175_v11 = vpack.c.bf16 %v41_v9, %v40_v8  ;;  %v42_v13 = vld [vmem:[%s266_s1 + $0x20] sm:$0xff]  ;;  %v44_v18 = vld [vmem:[%s266_s1 + $0x30] sm:$0xff]  ;;  %v45_v19 = vld [vmem:[%s266_s1 + $0x38] sm:$0xff]  ;;  %168 = vmatprep.mubr.msk.f32.mxu0 %vm206_vm0, %v207_v20  ;;  %v13_v30 = vand.u32 127, %v12_v28  ;;  %vm50_vm7 = vcmask 785408  }
   0x4   :  { %26 = vperm.xlu1 %198, %v24_v5   ;;  %v178_v17 = vpack.c.bf16 %v43_v14, %v42_v13  ;;  %v181_v21 = vpack.c.bf16 %v45_v19, %v44_v18  ;;  %v46_v22 = vld [vmem:[%s266_s1 + $0x40] sm:$0xff]  ;;  %v47_v23 = vld [vmem:[%s266_s1 + $0x48] sm:$0xff]  ;;  %v48_v25 = vld [vmem:[%s266_s1 + $0x50] sm:$0xff] }
   0x5   :  { %173 = vmatpush3.bf16.msra.mxu0 %v172_v7  ;;  %v184_v24 = vpack.c.bf16 %v47_v23, %v46_v22  ;;  %v49_v26 = vld [vmem:[%s266_s1 + $0x58] sm:$0xff] }
   0x6   :  { %174 = vmatprep.subr.bf16.mxu0 %v203_v6  ;;  %197 = vset.pattern.permute.xlu0 %v204_v15  ;;  %v187_v27 = vpack.c.bf16 %v49_v26, %v48_v25 }
   0x7   :  { %20 = vperm.xlu0 %197, %v18_v10  }
   0x8   :  { %199 = vset.pattern.permute.xlu1 %v205_v16 }
   0x9   :  { %176 = vmatpush3.bf16.msra.mxu0 %v175_v11  ;;  %32 = vperm.xlu1 %199, %v30_v12  }
   0xa   :  { %177 = vmatprep.subr.bf16.mxu0 %v203_v6 }
   0xb   :  { %200 = vset.pattern.permute.xlu0 %v205_v16 }
   0xd   :  { %179 = vmatpush3.bf16.msra.mxu0 %v178_v17 }
   0xe   :  { %180 = vmatprep.subr.bf16.mxu0 %v203_v6 }
  0x11   :  { %182 = vmatpush3.bf16.msra.mxu0 %v181_v21 }
  0x12   :  { %183 = vmatprep.subr.bf16.mxu0 %v203_v6 }
  0x15   :  { %185 = vmatpush3.bf16.msra.mxu0 %v184_v24 }
  0x16   :  { %186 = vmatprep.subr.bf16.mxu0 %v203_v6 }
  0x19   :  { %188 = vmatpush3.bf16.msra.mxu0 %v187_v27 }
  0x81   :  { %v16_v29 = vpop.permute.xlu0 %15 }
  0x82   :  { %vm17_vm1 = vcmp.eq.s32.totalorder %v13_v30, %v16_v29 }
  0x83   :  { %v27_v31 = vpop.permute.xlu1 %26 }
  0x84   :  { %vm28_vm3 = vcmp.eq.s32.totalorder %v13_v30, %v27_v31 }
  0x86   :  { %v21_v32 = vpop.permute.xlu0 %20 }
  0x87   :  { %vm22_vm2 = vcmp.eq.s32.totalorder %v13_v30, %v21_v32 }
  0x88   :  { %vm23_vm4 = vmor %vm17_vm1, %vm22_vm2  ;;  %v33_v33 = vpop.permute.xlu1 %32 }
  0x89   :  { %vm29_vm5 = vmor %vm23_vm4, %vm28_vm3  ;;  %vm34_vm6 = vcmp.eq.s32.totalorder %v13_v30, %v33_v33 }
  0x8a   :  { %vm35_vm8 = vmor %vm29_vm5, %vm34_vm6 }
  0x8b   :  { %v129_v34 = vsel %vm35_vm8, 1.0, %v207_v20 }
  0x8c   :  { %169 = vmatmul.mubr.msk.f32.vlgmr.msra.gmra.mrb[0].mxu0 %vm50_vm7, %v129_v34 }
 0x15f   :  { %v120_v35 = vpop.f32.mrb[0].mxu0 }
 0x160   :  { %124 = vst [vmem:[%s267_s2] sm:$0xff] %v120_v35  ;;  %v170_v36 = vpop.f32.mrb[1].mxu0 }

</bundles_post_ra>
